<compile_context>
chip_gen: v6e
topology: v6e:2x2x1
jax: 0.10.0
libtpu: 0.0.40
codegen_flags: <defaults>
</compile_context>

<pallas_src>
import math
from functools import partial

import jax
import jax.numpy as jnp
from jax.experimental import pallas as pl
from jax.experimental.pallas import tpu as pltpu


def _round_up(a, b):
    return ((a + b - 1) // b) * b


def _cdiv(a, b):
    return (a + b - 1) // b


def _gelu(x, approximate):
    if approximate:
        # tanh GELU -> EUP (its own bundle slot); essentially free filler.
        return jax.nn.gelu(x, approximate=True)
    # Exact erf formulation == PyTorch nn.GELU() default.
    return 0.5 * x * (1.0 + jax.lax.erf(x * (1.0 / math.sqrt(2.0))))


def _pick_tk(d_hid, target):
    """Largest multiple-of-128 divisor of d_hid that is <= target (else full)."""
    if d_hid % 128 != 0:
        return d_hid
    tk = min(target, d_hid)
    tk = max((tk // 128) * 128, 128)
    while d_hid % tk != 0:
        tk -= 128
    return max(tk, 128)


# ----------------------------------------------------------------------------
# Kernels
# ----------------------------------------------------------------------------
def mlp_fused_kernel(x_ref, w1_ref, b1_ref, w2_ref, b2_ref, o_ref, *, approximate):
    """Resident-weight path: grid = (row_tiles,). Full W1/W2 stay in VMEM."""
    h = jnp.dot(x_ref[...], w1_ref[...], preferred_element_type=jnp.float32)
    h = h + b1_ref[...].astype(jnp.float32)
    h = _gelu(h, approximate)
    # TODO(synk): dropout is identity here (inference / model.eval() semantics);
    # training-mode dropout would need pltpu.prng_* and a seed input.
    y = jnp.dot(h.astype(w2_ref.dtype), w2_ref[...],
                preferred_element_type=jnp.float32)
    o_ref[...] = (y + b2_ref[...].astype(jnp.float32)).astype(o_ref.dtype)


def mlp_chunked_kernel(x_ref, w1_ref, b1_ref, w2_ref, b2_ref, o_ref, acc_ref, *,
                       approximate):
    """Chunked path: grid = (row_tiles, K_tiles); k is the reduction axis."""
    k = pl.program_id(1)

    @pl.when(k == 0)
    def _():
        # Seed the accumulator with the fc2 bias -> no separate "+ b2" pass.
        acc_ref[...] = jnp.broadcast_to(b2_ref[...].astype(jnp.float32),
                                        acc_ref.shape)

    h = jnp.dot(x_ref[...], w1_ref[...], preferred_element_type=jnp.float32)
    h = h + b1_ref[...].astype(jnp.float32)
    h = _gelu(h, approximate)
    acc_ref[...] += jnp.dot(h.astype(w2_ref.dtype), w2_ref[...],
                            preferred_element_type=jnp.float32)

    @pl.when(k == pl.num_programs(1) - 1)
    def _():
        o_ref[...] = acc_ref[...].astype(o_ref.dtype)


# ----------------------------------------------------------------------------
# Wrapper
# ----------------------------------------------------------------------------
def mlp_forward(x, w1, b1, w2, b2, *, tm=None, tk=None, use_bf16=True,
                gelu_approximate=None):
    """x: [B, N, D_in]; w1: [D_in, D_hid]; w2: [D_hid, D_out]."""
    B, N, D_in = x.shape
    D_hid = w1.shape[1]
    D_out = w2.shape[1]
    M = B * N
    out_dtype = x.dtype

    if gelu_approximate is None:
        # Only move off the exact-erf GELU when bf16 already changed numerics.
        gelu_approximate = bool(use_bf16)

    if use_bf16:
        x = x.astype(jnp.bfloat16)
        w1 = w1.astype(jnp.bfloat16)
        w2 = w2.astype(jnp.bfloat16)

    in_itemsize = jnp.dtype(x.dtype).itemsize
    w_itemsize = jnp.dtype(w1.dtype).itemsize
    out_itemsize = jnp.dtype(out_dtype).itemsize

    # ---- Generation-aware VMEM budget (headroom below physical capacity) ----
    try:
        info = pltpu.get_tpu_info()
        vmem_cap = int(getattr(info, "vmem_capacity_bytes", 64 * 1024 * 1024))
    except Exception:
        vmem_cap = 64 * 1024 * 1024  # conservative (v7x-sized) fallback
    vmem_budget = min(vmem_cap - 12 * 1024 * 1024, int(vmem_cap * 0.8))
    vmem_budget = max(vmem_budget, 32 * 1024 * 1024)

    w_bytes = (D_in * D_hid + D_hid * D_out) * w_itemsize
    bias_bytes = (D_hid * jnp.dtype(b1.dtype).itemsize
                  + D_out * jnp.dtype(b2.dtype).itemsize)

    # Resident-weight path: W1/W2 block indices are constant across the grid,
    # so they are DMA'd from HBM exactly once.
    resident = (tk is None) and (w_bytes + bias_bytes <= vmem_budget // 3)

    # ---- Row tile ----
    row_mult = 16 if use_bf16 else 8      # bf16 packs 16 rows per vreg group
    if tm is None:
        tm = 256 if resident else 512     # streamed weights need bigger tm
    tm = max(row_mult, min(_round_up(tm, row_mult), _round_up(M, row_mult)))
    # v7x megacore: make sure the "parallel" row axis has >= 2 tiles.
    if M > row_mult and _cdiv(M, tm) < 2:
        tm = _round_up(_cdiv(M, 2), row_mult)
    M_pad = _round_up(M, tm)
    n_row_tiles = M_pad // tm

    x2 = x.reshape(M, D_in)
    if M_pad != M:
        x2 = jnp.pad(x2, ((0, M_pad - M), (0, 0)))
    b1_2 = b1.reshape(1, D_hid)
    b2_2 = b2.reshape(1, D_out)

    flops = 2 * M_pad * D_hid * (D_in + D_out)
    transcendentals = M_pad * D_hid

    if resident:
        grid = (n_row_tiles,)
        kernel = partial(mlp_fused_kernel, approximate=gelu_approximate)
        in_specs = [
            pl.BlockSpec((tm, D_in), lambda i: (i, 0)),      # x row tile
            pl.BlockSpec((D_in, D_hid), lambda i: (0, 0)),   # W1 (resident)
            pl.BlockSpec((1, D_hid), lambda i: (0, 0)),      # b1
            pl.BlockSpec((D_hid, D_out), lambda i: (0, 0)),  # W2 (resident)
            pl.BlockSpec((1, D_out), lambda i: (0, 0)),      # b2
        ]
        out_specs = pl.BlockSpec((tm, D_out), lambda i: (i, 0))
        scratch_shapes = []
        dim_sem = ("parallel",)
        bytes_accessed = (M_pad * D_in * in_itemsize + w_bytes + bias_bytes
                          + M_pad * D_out * out_itemsize)
        vmem_need = (2 * (tm * D_in * in_itemsize + tm * D_out * out_itemsize)
                     + 2 * (w_bytes + bias_bytes))
    else:
        def _chunk_need(tm_, tk_):
            return (2 * (tm_ * D_in * in_itemsize
                         + D_in * tk_ * w_itemsize + tk_ * 4
                         + tk_ * D_out * w_itemsize + D_out * 4
                         + tm_ * D_out * out_itemsize)
                    + tm_ * D_out * 4)

        if tk is None:
            tk = _pick_tk(D_hid, target=2048)
            while tk > 128 and _chunk_need(tm, tk) > vmem_budget:
                nxt = _pick_tk(D_hid, tk - 128)
                if nxt == tk:
                    break
                tk = nxt
        assert D_hid % tk == 0, "tk must divide the hidden dimension"

        grid = (n_row_tiles, D_hid // tk)
        kernel = partial(mlp_chunked_kernel, approximate=gelu_approximate)
        in_specs = [
            pl.BlockSpec((tm, D_in), lambda i, k: (i, 0)),    # x row tile
            pl.BlockSpec((D_in, tk), lambda i, k: (0, k)),    # W1 column chunk
            pl.BlockSpec((1, tk), lambda i, k: (0, k)),       # b1 chunk
            pl.BlockSpec((tk, D_out), lambda i, k: (k, 0)),   # W2 row chunk
            pl.BlockSpec((1, D_out), lambda i, k: (0, 0)),    # b2
        ]
        out_specs = pl.BlockSpec((tm, D_out), lambda i, k: (i, 0))
        scratch_shapes = [pltpu.VMEM((tm, D_out), jnp.float32)]
        dim_sem = ("parallel", "arbitrary")
        # Weights are re-streamed once per row tile in this path.
        bytes_accessed = (M_pad * D_in * in_itemsize
                          + n_row_tiles * (w_bytes + bias_bytes)
                          + M_pad * D_out * out_itemsize)
        vmem_need = _chunk_need(tm, tk)

    vmem_limit = int(min(max(vmem_need + 8 * 1024 * 1024, 32 * 1024 * 1024),
                         vmem_budget))

    cost = pl.CostEstimate(flops=flops, transcendentals=transcendentals,
                           bytes_accessed=int(bytes_accessed))

    out2 = pl.pallas_call(
        kernel,
        out_shape=jax.ShapeDtypeStruct((M_pad, D_out), out_dtype),
        grid_spec=pltpu.PrefetchScalarGridSpec(
            num_scalar_prefetch=0,
            grid=grid,
            in_specs=in_specs,
            out_specs=out_specs,
            scratch_shapes=scratch_shapes,
        ),
        compiler_params=pltpu.CompilerParams(
            dimension_semantics=dim_sem,
            vmem_limit_bytes=vmem_limit,
        ),
        cost_estimate=cost,
    )(x2, w1, b1_2, w2, b2_2)

    if M_pad != M:
        out2 = out2[:M]
    return out2.reshape(B, N, D_out)


# ----------------------------------------------------------------------------
# Parameter init (matches nn.Linear defaults) and reference
# ----------------------------------------------------------------------------
def init_mlp_params(key, in_features, hidden_features=None, out_features=None,
                    dtype=jnp.float32):
    out_features = out_features or in_features
    hidden_features = hidden_features or in_features
    k1, k2, k3, k4 = jax.random.split(key, 4)

    bound1 = 1.0 / math.sqrt(in_features)
    w1 = jax.random.uniform(k1, (in_features, hidden_features),
                            minval=-bound1, maxval=bound1, dtype=dtype)
    b1 = jax.random.uniform(k2, (hidden_features,),
                            minval=-bound1, maxval=bound1, dtype=dtype)

    bound2 = 1.0 / math.sqrt(hidden_features)
    w2 = jax.random.uniform(k3, (hidden_features, out_features),
                            minval=-bound2, maxval=bound2, dtype=dtype)
    b2 = jax.random.uniform(k4, (out_features,),
                            minval=-bound2, maxval=bound2, dtype=dtype)
    return w1, b1, w2, b2


def _ref_mlp(x, w1, b1, w2, b2):
    B, N, D_in = x.shape
    h = _gelu(x.reshape(-1, D_in) @ w1 + b1, approximate=False)
    return (h @ w2 + b2).reshape(B, N, w2.shape[1])


if __name__ == "__main__":
    key = jax.random.PRNGKey(0)
    k_x, k_p, k_x2, k_p2, k_x3, k_p3 = jax.random.split(key, 6)

    # Test 1: f32, exact GELU (resident-weight path), tight tolerance.
    B, N, D_in, D_hid = 2, 8, 32, 64
    x = jax.random.normal(k_x, (B, N, D_in), dtype=jnp.float32)
    w1, b1, w2, b2 = init_mlp_params(k_p, D_in, hidden_features=D_hid)
    y = jax.block_until_ready(mlp_forward(x, w1, b1, w2, b2, use_bf16=False))
    y_ref = _ref_mlp(x, w1, b1, w2, b2)
    assert jnp.allclose(y, y_ref, atol=1e-5, rtol=1e-5), "mismatch (test 1, f32)"

    # Test 2: default performance path (bf16 operands, tanh GELU), ragged M
    # (exercises padding + >=2 row tiles) and out_features != in_features.
    B2, N2, Di2, Dh2, Do2 = 2, 10, 32, 64, 48
    x2 = jax.random.normal(k_x2, (B2, N2, Di2), dtype=jnp.float32)
    w1b, b1b, w2b, b2b = init_mlp_params(k_p2, Di2, hidden_features=Dh2,
                                         out_features=Do2)
    y2 = jax.block_until_ready(mlp_forward(x2, w1b, b1b, w2b, b2b))
    y2_ref = _ref_mlp(x2, w1b, b1b, w2b, b2b)
    assert jnp.allclose(y2, y2_ref, atol=5e-2, rtol=5e-2), "mismatch (test 2, bf16)"

    # Test 3: force the chunked (k-reduction) path, f32, tight tolerance
    # (exercises the b2-seeded accumulator and multi-step reduction).
    B3, N3, Di3, Dh3, Do3 = 2, 8, 32, 256, 32
    x3 = jax.random.normal(k_x3, (B3, N3, Di3), dtype=jnp.float32)
    w1c, b1c, w2c, b2c = init_mlp_params(k_p3, Di3, hidden_features=Dh3,
                                         out_features=Do3)
    y3 = jax.block_until_ready(
        mlp_forward(x3, w1c, b1c, w2c, b2c, use_bf16=False, tk=128))
    y3_ref = _ref_mlp(x3, w1c, b1c, w2c, b2c)
    assert jnp.allclose(y3, y3_ref, atol=1e-5, rtol=1e-5), "mismatch (test 3, chunked)"

    print("KERNEL_OK")
</pallas_src>

<mosaic_0001>
module attributes {stable_mosaic.version = 11 : i64} {
  func.func @mlp_fused_kernel(%arg0: i32, %arg1: memref<8x32xf32, #tpu.memory_space<vmem>>, %arg2: memref<32x64xf32, #tpu.memory_space<vmem>>, %arg3: memref<1x64xf32, #tpu.memory_space<vmem>>, %arg4: memref<64x32xf32, #tpu.memory_space<vmem>>, %arg5: memref<1x32xf32, #tpu.memory_space<vmem>>, %arg6: memref<8x32xf32, #tpu.memory_space<vmem>>) attributes {dimension_semantics = [#tpu.dimension_semantics<parallel>], iteration_bounds = array<i64: 2>, scalar_prefetch = 0 : i64, scratch_operands = 0 : i64, tpu.core_type = #tpu.core_type<tc>, window_params = [{transform_indices = @transform_0, window_bounds = array<i64: 8, 32>}, {pipeline_mode = #tpu.pipeline_mode<synchronous>, transform_indices = @transform_1, window_bounds = array<i64: 32, 64>}, {pipeline_mode = #tpu.pipeline_mode<synchronous>, transform_indices = @transform_2, window_bounds = array<i64: 1, 64>}, {pipeline_mode = #tpu.pipeline_mode<synchronous>, transform_indices = @transform_3, window_bounds = array<i64: 64, 32>}, {pipeline_mode = #tpu.pipeline_mode<synchronous>, transform_indices = @transform_4, window_bounds = array<i64: 1, 32>}, {transform_indices = @transform_5, window_bounds = array<i64: 8, 32>}]} {
    %c0 = arith.constant 0 : index
    %c0_0 = arith.constant 0 : index
    %0 = vector.load %arg1[%c0, %c0_0] : memref<8x32xf32, #tpu.memory_space<vmem>>, vector<8x32xf32>
    %c0_1 = arith.constant 0 : index
    %c0_2 = arith.constant 0 : index
    %1 = vector.load %arg2[%c0_1, %c0_2] : memref<32x64xf32, #tpu.memory_space<vmem>>, vector<32x64xf32>
    %cst = arith.constant dense<0.000000e+00> : vector<8x64xf32>
    %2 = tpu.matmul %0, %1, %cst {dimension_numbers = #tpu.dot_dimension_numbers<[1], [0], [0], [1], [0, 0, 1, 1], [], []>} : vector<8x32xf32>, vector<32x64xf32>, vector<8x64xf32> -> vector<8x64xf32>
    %c0_3 = arith.constant 0 : index
    %c0_4 = arith.constant 0 : index
    %3 = vector.load %arg3[%c0_3, %c0_4] : memref<1x64xf32, #tpu.memory_space<vmem>>, vector<1x64xf32>
    %4 = vector.broadcast %3 : vector<1x64xf32> to vector<8x64xf32>
    %5 = arith.addf %2, %4 : vector<8x64xf32>
    %cst_5 = arith.constant 5.000000e-01 : f32
    %6 = vector.broadcast %cst_5 : f32 to vector<8x64xf32>
    %7 = arith.mulf %6, %5 : vector<8x64xf32>
    %cst_6 = arith.constant 0.707106769 : f32
    %8 = vector.broadcast %cst_6 : f32 to vector<8x64xf32>
    %9 = arith.mulf %5, %8 : vector<8x64xf32>
    %10 = math.erf %9 : vector<8x64xf32>
    %cst_7 = arith.constant 1.000000e+00 : f32
    %11 = vector.broadcast %cst_7 : f32 to vector<8x64xf32>
    %12 = arith.addf %11, %10 : vector<8x64xf32>
    %13 = arith.mulf %7, %12 : vector<8x64xf32>
    %c0_8 = arith.constant 0 : index
    %c0_9 = arith.constant 0 : index
    %14 = vector.load %arg4[%c0_8, %c0_9] : memref<64x32xf32, #tpu.memory_space<vmem>>, vector<64x32xf32>
    %cst_10 = arith.constant dense<0.000000e+00> : vector<8x32xf32>
    %15 = tpu.matmul %13, %14, %cst_10 {dimension_numbers = #tpu.dot_dimension_numbers<[1], [0], [0], [1], [0, 0, 1, 1], [], []>} : vector<8x64xf32>, vector<64x32xf32>, vector<8x32xf32> -> vector<8x32xf32>
    %c0_11 = arith.constant 0 : index
    %c0_12 = arith.constant 0 : index
    %16 = vector.load %arg5[%c0_11, %c0_12] : memref<1x32xf32, #tpu.memory_space<vmem>>, vector<1x32xf32>
    %17 = vector.broadcast %16 : vector<1x32xf32> to vector<8x32xf32>
    %18 = arith.addf %15, %17 : vector<8x32xf32>
    %c0_13 = arith.constant 0 : index
    %c0_14 = arith.constant 0 : index
    %19 = vector.load %arg6[%c0_13, %c0_14] : memref<8x32xf32, #tpu.memory_space<vmem>>, vector<8x32xf32>
    tpu.vector_store %arg6[%c0_13, %c0_14], %18 {strides = array<i32>} : memref<8x32xf32, #tpu.memory_space<vmem>>, vector<8x32xf32>,
    return
  }
  func.func @transform_0(%arg0: i32) -> (i32, i32) {
    %c0_i32 = arith.constant 0 : i32
    %c0_i32_0 = arith.constant 0 : i32
    return %arg0, %c0_i32 : i32, i32
  }
  func.func @transform_1(%arg0: i32) -> (i32, i32) {
    %c0_i32 = arith.constant 0 : i32
    %c0_i32_0 = arith.constant 0 : i32
    %c0_i32_1 = arith.constant 0 : i32
    return %c0_i32, %c0_i32_0 : i32, i32
  }
  func.func @transform_2(%arg0: i32) -> (i32, i32) {
    %c0_i32 = arith.constant 0 : i32
    %c0_i32_0 = arith.constant 0 : i32
    %c0_i32_1 = arith.constant 0 : i32
    return %c0_i32, %c0_i32_0 : i32, i32
  }
  func.func @transform_3(%arg0: i32) -> (i32, i32) {
    %c0_i32 = arith.constant 0 : i32
    %c0_i32_0 = arith.constant 0 : i32
    %c0_i32_1 = arith.constant 0 : i32
    return %c0_i32, %c0_i32_0 : i32, i32
  }
  func.func @transform_4(%arg0: i32) -> (i32, i32) {
    %c0_i32 = arith.constant 0 : i32
    %c0_i32_0 = arith.constant 0 : i32
    %c0_i32_1 = arith.constant 0 : i32
    return %c0_i32, %c0_i32_0 : i32, i32
  }
  func.func @transform_5(%arg0: i32) -> (i32, i32) {
    %c0_i32 = arith.constant 0 : i32
    %c0_i32_0 = arith.constant 0 : i32
    return %arg0, %c0_i32 : i32, i32
  }
}

</mosaic_0001>

<bundles_post_ra>
// kernel: tpu_custom_call.1
= control target key start
LH: loop header
LB: loop body
LE: loop exit
PB: predicated region body
PF: predicated region fallthrough
CT: control target
= control target key end

     0   :  { %10 = vsyncpa [#allocation3], 0  ;;  %s807_s0 = inlined_call_operand.vmem [shape: f32[16,32], index: 0, kind: input, shape index: {}]   ;;  %s808_s1 = inlined_call_operand.vmem [shape: f32[32,64], index: 1, kind: input, shape index: {}]   ;;  %s809_s2 = inlined_call_operand.vmem [shape: f32[1,64], index: 2, kind: input, shape index: {}]   ;;  %s810_s3 = inlined_call_operand.vmem [shape: f32[64,32], index: 3, kind: input, shape index: {}]   ;;  %s811_s4 = inlined_call_operand.vmem [shape: f32[1,32], index: 4, kind: input, shape index: {}]   ;;  %s812_s5 = inlined_call_operand.hbm [shape: f32[16,32], index: 5, kind: output, shape index: {}]  }
   0x1   :  { %12 = vsyncpa [#allocation3 + $0x1], 0  ;;  %s670_s18 = smov 0   ;;  %s672_s19 = smov 0  }
   0x2   :  { %s674_s20 = smov 0   ;;  %s676_s21 = smov 0  }
   0x3 LB: > { %s691_s22 = sadd.s32 4294967295, %s635_s21   ;;  %s474_s23 = sadd.s32 4294967294, %s635_s21   ;;  %s635_s21 = sphi %s676_s21, %s818_s21   ;;  %s631_s20 = sphi %s674_s20, %s817_s20   ;;  %s627_s19 = sphi %s672_s19, %s816_s19   ;;  %s623_s18 = sphi %s670_s18, %s815_s18  }
   0x4   : > { %s695_s24 = sadd.s32 1, %s635_s21   ;;  %s135_s25 = sadd.s32 1, %s631_s20 }
   0x5   : > { %s132_s26 = ssub.s32 %s635_s21, %s695_s24  ;;  %p145_p0 = scmp.ne.s32.totalorder %s631_s20, %s627_s19 }
   0x6   : > { %p133_p1 = scmp.eq.s32.totalorder %s132_s26, 0  ;;  %p146_p2 = scmp.eq.s32.totalorder %s691_s22, 1 }
   0x7   : > { %p151_p3 = scmp.ne.s32.totalorder %s627_s19, %s623_s18  ;;  %p152_p4 = scmp.eq.s32.totalorder %s474_s23, 1 }
   0x8   : > { %s706_s27 = scalar_select %p133_p1, %s631_s20, %s135_s25  }
   0x9   : > { %p708_p5 = por %p146_p2, %p145_p0  ;;  %p712_p6 = por %p152_p4, %p151_p3 }
   0xa   : > { %p477_p7 = scmp.ge.s32.totalorder %s635_s21, 1  ;;  %p189_p8 = scmp.lt.s32.totalorder %s635_s21, 3 }
   0xc   : > { %p190_p9 = pnand %p477_p7, %p189_p8 }
   0xd   : > { %p216_p10 = scmp.lt.s32.totalorder (!%p190_p9), %s691_s22, 1  ;;  %s213_s26 = sand.u32 (!%p190_p9), 1, %s627_s19  }
   0xe   : > { %193 = sbr.rel (%p190_p9) target bundleno = 451 (0x1c3), region = 40  ;;  %s478_s30 = sshll.u32 (!%p190_p9), %s213_s26, 3 }
   0xf   : > { %s485_s8 = sshll.u32 (!%p190_p9), %s691_s22, 7  ;;  %s402_s14 = scalar_lea.sflag (!%p190_p9), [#allocation3], %s213_s26 }
  0x10   : > { %s771_s13 = scalar_lea.hbm (!%p190_p9), %s812_s5, %s485_s8 }
  0x13   : > { %v224_v0 = vld [vmem:[%s808_s1 + $0x18] sm:$0xff]  ;;  %v637_v1 = vmov 0.0   ;;  %v223_v2 = vld [vmem:[%s808_s1 + $0x10] sm:$0xff]  ;;  %vm638_vm0 = vmmov 0   ;;  %s217_s9 = scalar_select %p216_p10, %s691_s22, 1  ;;  %v222_v3 = vld [vmem:[%s808_s1 + $0x8] sm:$0xff] }
  0x14   : > { %502 = vmatprep.subr.mxu0 %v637_v1  ;;  %510 = vmatprep.mubr.msk.f32.mxu0 %vm638_vm0, %v637_v1  ;;  %v221_v4 = vld [vmem:[%s808_s1] sm:$0xff]  ;;  %vm232_vm1 = vcmask 261120   ;;  %v318_v6 = vld [vmem:[%s810_s3 + $0x38] sm:$0xff]  ;;  %v317_v7 = vld [vmem:[%s810_s3 + $0x30] sm:$0xff]  ;;  %vm326_vm2 = vcmask 523264   ;;  %s639_s22 = smov [#allocation2]  }
  0x15   : > { %503 = vmatpush3.msra.mxu0 %v224_v0  ;;  %513 = vmatprep.subr.mxu1 %v637_v1  ;;  %s479_s12 = sshll.u32 %s217_s9, 3  ;;  %v316_v8 = vld [vmem:[%s810_s3 + $0x28] sm:$0xff]  ;;  %v315_v9 = vld [vmem:[%s810_s3 + $0x20] sm:$0xff]  ;;  %v314_v10 = vld [vmem:[%s810_s3 + $0x18] sm:$0xff]  ;;  %s215_s9 = scalar_lea.vmem [#allocation2], %s478_s30 }
  0x16   : > { %504 = vmatprep.subr.mxu0 %v637_v1  ;;  %529 = vmatprep.mubr.msk.f32.mxu1 %vm638_vm0, %v637_v1  ;;  %s219_s17 = scalar_lea.vmem %s807_s0, %s479_s12  ;;  %v313_v11 = vld [vmem:[%s810_s3 + $0x10] sm:$0xff]  ;;  %v312_v12 = vld [vmem:[%s810_s3 + $0x8] sm:$0xff]  ;;  %v311_v13 = vld [vmem:[%s810_s3] sm:$0xff]  ;;  %s415_s10 = sshll.u32 %s215_s9, 4  ;;  %s416_s10 = int_to_ptr.vmem [resolvable:$true] %s415_s10 }
  0x17   : > { %505 = vmatpush3.msra.mxu0 %v223_v2  ;;  %v220_v5 = vld [vmem:[%s219_s17] sm:$0xff]  ;;  %514 = vmatpush3.msra.mxu1 %v318_v6  ;;  %s575_s15 = scalar_lea.vmem %s416_s10, 128  ;;  %s579_s16 = sshll.u32 %s639_s22, 4  ;;  %s580_s16 = int_to_ptr.vmem [resolvable:$false] %s579_s16 }
  0x18   : > { %506 = vmatprep.subr.mxu0 %v637_v1  ;;  %515 = vmatprep.subr.mxu1 %v637_v1  ;;  %v480_v14 = vld [vmem:[%s809_s2] ss:$0 sm:$0xff]  ;;  %p576_p11 = scmp.ne.s32.totalorder %s416_s10, %s575_s15  ;;  %s581_s17 = scalar_lea.vmem %s580_s16, 256 }
  0x19   : > { %507 = vmatpush3.msra.mxu0 %v222_v3  ;;  %516 = vmatpush3.msra.mxu1 %v317_v7  ;;  %v482_v23 = vld [vmem:[%s811_s4] ss:$0 sm:$0xff]  ;;  %p582_p0 = scmp.lt.s32.totalorder %s416_s10, %s580_s16  ;;  %p583_p1 = scmp.lt.s32.totalorder %s581_s17, %s575_s15 }
  0x1a   : > { %508 = vmatprep.subr.mxu0 %v637_v1  ;;  %517 = vmatprep.subr.mxu1 %v637_v1  ;;  %p577_p12 = pnand %p576_p11, %p708_p5 }
  0x1b   : > { %509 = vmatpush3.msra.mxu0 %v221_v4  ;;  %518 = vmatpush3.msra.mxu1 %v316_v8  ;;  %p584_p2 = por %p583_p1, %p582_p0 }
  0x1c   : > { %511 = vmatmul.mubr.msk.f32.vlgmr.msra.gmra.mxu0 %vm232_vm1, %v220_v5  ;;  %519 = vmatprep.subr.mxu1 %v637_v1  ;;  %p578_p13 = pneg %p577_p12 }
  0x1d   : > { %520 = vmatpush3.msra.mxu1 %v315_v9 }
  0x1e   : > { %521 = vmatprep.subr.mxu1 %v637_v1  ;;  %p585_p3 = pnand %p584_p2, %p578_p13 }
  0x1f   : > { %522 = vmatpush3.msra.mxu1 %v314_v10 }
  0x20   : > { %523 = vmatprep.subr.mxu1 %v637_v1 }
  0x21   : > { %524 = vmatpush3.msra.mxu1 %v313_v11 }
  0x22   : > { %525 = vmatprep.subr.mxu1 %v637_v1 }
  0x23   : > { %526 = vmatpush3.msra.mxu1 %v312_v12 }
  0x24   : > { %527 = vmatprep.subr.mxu1 %v637_v1 }
  0x25   : > { %528 = vmatpush3.msra.mxu1 %v311_v13 }
  0xdc   : > { %v302_v15 = vpop.f32.mrf.mxu0 }
  0xdd   : > { %v303_v16 = vadd.f32 %v480_v14, %v302_v15 }
  0xde   : > { %v512_v17 = vpop.f32.mrf.mxu0 }
  0xdf   : > { %v307_v18 = vmul.f32 0.70710677, %v303_v16  ;;  %v306_v20 = vmul.f32 0.5, %v303_v16 }
  0xe1   : > { %573 = verf.f32 %v307_v18 }
  0xee   : > { %v574_v19 = vpop.eup %573 }
  0xef   : > { %v309_v21 = vadd.f32 1.0, %v574_v19 }
  0xf1   : > { %v310_v22 = vmul.f32 %v309_v21, %v306_v20 }
  0xf3   : > { %530 = vmatmul.mubr.msk.f32.vlgmr.msra.gmra.mxu1 %vm326_vm2, %v310_v22 }
 0x1b3   : > { %v396_v24 = vpop.f32.mrf.mxu1 }
 0x1b4   : > { %v397_v25 = vadd.f32 %v482_v23, %v396_v24 }
 0x1b5   : > { %v531_v26 = vpop.f32.mrf.mxu1 }
 0x1b6   : > { %400 = vst.msk [vmem:[%s215_s9] sm:$0xff] %vm232_vm1, %v397_v25 }
 0x1b7   : > { %588 = shalt.err (!%p585_p3)
}
 0x1b8   : > { %s589_s23 = scalar_lea.hbm %s771_s13, 128  ;;  %s593_s30 = scalar_lea.hbm %s812_s5, 256 }
 0x1b9   : > { %p590_p4 = scmp.ne.s32.totalorder %s771_s13, %s589_s23  ;;  %p594_p9 = scmp.lt.s32.totalorder %s771_s13, %s812_s5 }
 0x1ba   : > { %p595_p10 = scmp.lt.s32.totalorder %s593_s30, %s589_s23 }
 0x1bb   : > { %p591_p7 = pnand %p590_p4, %p708_p5 }
 0x1bc   : > { %p596_p11 = por %p595_p10, %p594_p9 }
 0x1bd   : > { %p592_p8 = pneg %p591_p7 }
 0x1bf   : > { %p597_p12 = pnand %p596_p11, %p592_p8 }
 0x1c1   : > { %600 = shalt.err (!%p597_p12)
}
 0x1c2   : > { %532 = dma.vmem_to_hbm [thread:$0]  (%p708_p5), %s416_s10, 128, %s771_s13, %s402_s14  }
 0x1c3 PF: > { %p538_p13 = scmp.ge.s32.totalorder %s635_s21, 2  ;;  %s427_s8 = sand.u32 1, %s623_s18  }
 0x1c4   : > { %s428_s9 = scalar_lea.sflag [#allocation3], %s427_s8 }
 0x1c5   : > { %p535_p0 = pnand %p538_p13, %p712_p6 }
 0x1c7   : > { %p536_p1 = pneg %p535_p0 }
 0x1c9   : > { %618 = dma.done.wait (%p536_p1), %s428_s9, 128  }
 0x1ca   : > { %620 = vsyncadd (%p536_p1), %s428_s9, 4294967168  ;;  %p15_p2 = scmp.ge.s32.totalorder %s695_s24, 4   ;;  %s815_s18 = smov %s627_s19 }
 0x1cb   : > { %s816_s19 = smov %s631_s20  ;;  %s817_s20 = smov %s706_s27 }
 0x1cc   : > { %s818_s21 = smov %s695_s24  ;;  %17 = sbr.rel (!%p15_p2) target bundleno = 3 (0x3), region = 75 }
 0x1d1   :  { %433 = vsyncpa [#allocation3], 1 }
 0x1d2   :  { %435 = vsyncpa [#allocation3 + $0x1], 1 }

</bundles_post_ra>
